<compile_context>
chip_gen: v7x
topology: tpu7x:2x2x1
jax: 0.10.0
libtpu: 0.0.40
codegen_flags: <defaults>
</compile_context>

<pallas_src>
import functools

import jax
import jax.numpy as jnp
import numpy as np
from jax import lax
from jax.experimental import pallas as pl
from jax.experimental.pallas import tpu as pltpu

_LANE = 128      # output last dim padded to a multiple of this (lane-dense stores)
_SUBLANE = 8     # batch rows padded to a multiple of this (full sublanes)
_SMALL_K = 32    # contractions with K <= this skip the MXU (VPU broadcast-FMAs).
                 # v5e MXU pads K to 128 (break-even sooner); v6e/v7x pad to 256.
_MAX_T_CHUNK = 128   # timesteps per grid iteration in the fused recurrence


def _round_up(x, m):
    return (x + m - 1) // m * m


def _igate(x, wih):
    """Input gate x @ W_ih in f32.  x: (..., K), wih: (K, Hp)."""
    k = x.shape[-1]
    if k <= _SMALL_K:
        # Tiny contraction: K broadcast multiply-adds on the VPU; an MXU pass
        # would pad K to 128 (v5e) / 256 (v6e, v7x) and waste the array.
        acc = x[..., 0:1].astype(jnp.float32) * wih[0:1, :].astype(jnp.float32)
        for i in range(1, k):
            acc = acc + x[..., i:i + 1].astype(jnp.float32) * wih[i:i + 1, :].astype(jnp.float32)
        return acc
    # Larger K: use the MXU; cast to bf16 on v6e/v7x (bf16-native) with f32 acc.
    return jnp.dot(x.astype(jnp.bfloat16), wih.astype(jnp.bfloat16),
                   preferred_element_type=jnp.float32)


# ---------------------------------------------------------------------------
# Parameter preparation (done ONCE, outside any step loop): fold the biases and
# pad the hidden axis to a lane-dense multiple of 128.
# ---------------------------------------------------------------------------
def prepare_params(weight_ih, weight_hh, bias_ih=None, bias_hh=None):
    I, H = weight_ih.shape
    Hp = _round_up(H, _LANE)
    wih_p = jnp.pad(weight_ih, ((0, 0), (0, Hp - H)))
    whh_p = jnp.pad(weight_hh, (0, Hp - H)).reshape(1, Hp)
    bias = jnp.zeros((H,), weight_ih.dtype)
    if bias_ih is not None:
        bias = bias + bias_ih
    if bias_hh is not None:
        bias = bias + bias_hh
    bias_p = jnp.pad(bias, (0, Hp - H)).reshape(1, Hp)
    return wih_p, whh_p, bias_p


# ---------------------------------------------------------------------------
# Single-step cell (matches the PyTorch module's forward exactly: raw gate).
# ---------------------------------------------------------------------------
def _cell_kernel(x_ref, h_ref, wih_ref, whh_ref, b_ref, out_ref):
    gate = (_igate(x_ref[...], wih_ref[...])
            + h_ref[...].astype(jnp.float32) * whh_ref[...].astype(jnp.float32)
            + b_ref[...].astype(jnp.float32))
    # TODO(synk): the PyTorch forward returns the raw gate (no relu in forward);
    # matched here intentionally.
    out_ref[...] = gate.astype(out_ref.dtype)


@functools.partial(jax.jit, static_argnames=("hidden_size",))
def indrnn_cell(x, hstate, wih_p, whh_p, bias_p, hidden_size):
    """x: (B, I), hstate: (B, H); params already padded/folded by prepare_params."""
    B, I = x.shape
    Hp = wih_p.shape[1]
    Bp = _round_up(B, _SUBLANE)
    x_p = jnp.pad(x, ((0, Bp - B), (0, 0)))
    h_p = jnp.pad(hstate, ((0, Bp - B), (0, Hp - hstate.shape[1])))

    full = lambda shape: pl.BlockSpec(shape, lambda: (0,) * len(shape))
    out = pl.pallas_call(
        _cell_kernel,
        out_shape=jax.ShapeDtypeStruct((Bp, Hp), x.dtype),
        grid=(),
        in_specs=[full((Bp, I)), full((Bp, Hp)), full((I, Hp)),
                  full((1, Hp)), full((1, Hp))],
        out_specs=full((Bp, Hp)),
    )(x_p, h_p, wih_p, whh_p, bias_p)
    return out[:B, :hidden_size]


# ---------------------------------------------------------------------------
# Fused recurrence: time grid collapsed into chunks of up to _MAX_T_CHUNK steps.
# Per chunk: time-parallel input projection (prologue, staged in VMEM scratch),
# then an unrolled serial loop that is purely elementwise.  The hidden state is
# carried across chunks in an f32 VMEM scratch.
# ---------------------------------------------------------------------------
def _seq_kernel(xs_ref, h0_ref, wih_ref, whh_ref, b_ref, out_ref, h_acc, ig_scr):
    c = pl.program_id(0)

    @pl.when(c == 0)
    def _():
        h_acc[...] = h0_ref[...].astype(jnp.float32)

    Tc = out_ref.shape[0]

    # --- time-parallel prologue: igate_t + bias for all timesteps of the chunk.
    xs = xs_ref[...]                                    # (Tc, Bp, I)
    ig = _igate(xs, wih_ref[...]) + b_ref[...].astype(jnp.float32)
    ig_scr[...] = ig                                    # stage in VMEM scratch

    # --- hoisted: load w_hh once, cast once, broadcast once.
    whh_b = jnp.broadcast_to(whh_ref[...].astype(jnp.float32), h_acc.shape)

    # --- serial recurrence: one mul + one add per element per step.
    def body(t, h):
        gate = ig_scr[t] + h * whh_b
        out_ref[t] = gate.astype(out_ref.dtype)
        return gate

    h_acc[...] = lax.fori_loop(0, Tc, body, h_acc[...], unroll=True)


@functools.partial(jax.jit, static_argnames=("hidden_size",))
def indrnn_sequence(xs, h0, wih_p, whh_p, bias_p, hidden_size):
    """xs: (T, B, I), h0: (B, H) -> (T, B, H) of per-step gates (h_t = gate_t)."""
    T, B, I = xs.shape
    Hp = wih_p.shape[1]
    Bp = _round_up(B, _SUBLANE)

    t_chunk = T if T <= _MAX_T_CHUNK else _MAX_T_CHUNK
    Tp = _round_up(T, t_chunk)
    num_chunks = Tp // t_chunk

    xs_p = jnp.pad(xs, ((0, Tp - T), (0, Bp - B), (0, 0)))
    h0_p = jnp.pad(h0, ((0, Bp - B), (0, Hp - h0.shape[1])))

    out = pl.pallas_call(
        _seq_kernel,
        out_shape=jax.ShapeDtypeStruct((Tp, Bp, Hp), xs.dtype),
        grid_spec=pltpu.PrefetchScalarGridSpec(
            num_scalar_prefetch=0,
            grid=(num_chunks,),
            in_specs=[
                pl.BlockSpec((t_chunk, Bp, I), lambda c: (c, 0, 0)),  # chunk of inputs
                pl.BlockSpec((Bp, Hp), lambda c: (0, 0)),             # h0 (read at c=0)
                pl.BlockSpec((I, Hp), lambda c: (0, 0)),              # resident W_ih
                pl.BlockSpec((1, Hp), lambda c: (0, 0)),              # resident w_hh
                pl.BlockSpec((1, Hp), lambda c: (0, 0)),              # resident bias
            ],
            out_specs=pl.BlockSpec((t_chunk, Bp, Hp), lambda c: (c, 0, 0)),
            scratch_shapes=[
                pltpu.VMEM((Bp, Hp), jnp.float32),            # carried hidden state
                pltpu.VMEM((t_chunk, Bp, Hp), jnp.float32),   # staged igate + bias
            ],
        ),
        compiler_params=pltpu.CompilerParams(
            dimension_semantics=("arbitrary",),   # sequential: carried hidden state
        ),
    )(xs_p, h0_p, wih_p, whh_p, bias_p)
    return out[:T, :B, :hidden_size]


if __name__ == "__main__":
    # Module config: c.NONLINEARITY == 'relu', bias=True, no weight constraint.
    input_size = 4
    hidden_size = 32
    batch = 2
    seq_len = 8

    key = jax.random.PRNGKey(0)
    k_x, k_xs, k_h, k_wih, k_whh = jax.random.split(key, 5)

    std = float(np.sqrt(2.0 / input_size))
    weight_ih = (std * jax.random.normal(k_wih, (input_size, hidden_size))).astype(jnp.float32)
    weight_hh = (std * jax.random.normal(k_whh, (hidden_size,))).astype(jnp.float32)
    bias_ih = jnp.zeros((hidden_size,), jnp.float32)
    bias_hh = jnp.zeros((hidden_size,), jnp.float32)

    # Pad / fold parameters once.
    wih_p, whh_p, bias_p = prepare_params(weight_ih, weight_hh, bias_ih, bias_hh)

    # --- single-step cell (the module's forward) ---
    x = jax.random.normal(k_x, (batch, input_size), dtype=jnp.float32)
    hstate = jax.random.normal(k_h, (batch, hidden_size), dtype=jnp.float32)

    out = jax.block_until_ready(indrnn_cell(x, hstate, wih_p, whh_p, bias_p, hidden_size))
    ref = x @ weight_ih + bias_ih + hstate * weight_hh + bias_hh
    np.testing.assert_allclose(np.asarray(out), np.asarray(ref), rtol=1e-5, atol=1e-5)

    # --- fused recurrence over T steps (time loop collapsed into the kernel) ---
    xs = jax.random.normal(k_xs, (seq_len, batch, input_size), dtype=jnp.float32)
    h0 = jnp.zeros((batch, hidden_size), jnp.float32)
    outs = jax.block_until_ready(indrnn_sequence(xs, h0, wih_p, whh_p, bias_p, hidden_size))

    # Pure-JAX reference: the cell applied recurrently (gate fed back as hstate,
    # exactly what driving the PyTorch module step-by-step would do).
    h = h0
    refs = []
    for t in range(seq_len):
        h = xs[t] @ weight_ih + bias_ih + h * weight_hh + bias_hh
        refs.append(h)
    refs = jnp.stack(refs)
    np.testing.assert_allclose(np.asarray(outs), np.asarray(refs), rtol=1e-4, atol=1e-5)

    print("KERNEL_OK")
</pallas_src>

<mosaic_0001>
module attributes {stable_mosaic.version = 11 : i64} {
  func.func @_cell_kernel(%arg0: memref<8x4xf32, #tpu.memory_space<vmem>>, %arg1: memref<8x128xf32, #tpu.memory_space<vmem>>, %arg2: memref<4x128xf32, #tpu.memory_space<vmem>>, %arg3: memref<1x128xf32, #tpu.memory_space<vmem>>, %arg4: memref<1x128xf32, #tpu.memory_space<vmem>>, %arg5: memref<8x128xf32, #tpu.memory_space<vmem>>) attributes {dimension_semantics = [], scalar_prefetch = 0 : i64, scratch_operands = 0 : i64, tpu.core_type = #tpu.core_type<tc>} {
    %c0 = arith.constant 0 : index
    %c0_0 = arith.constant 0 : index
    %0 = vector.load %arg0[%c0, %c0_0] : memref<8x4xf32, #tpu.memory_space<vmem>>, vector<8x4xf32>
    %c0_1 = arith.constant 0 : index
    %c0_2 = arith.constant 0 : index
    %1 = vector.load %arg2[%c0_1, %c0_2] : memref<4x128xf32, #tpu.memory_space<vmem>>, vector<4x128xf32>
    %2 = vector.extract_strided_slice %0 {offsets = [0, 0], sizes = [8, 1], strides = [1, 1]} : vector<8x4xf32> to vector<8x1xf32>
    %3 = vector.extract_strided_slice %1 {offsets = [0, 0], sizes = [1, 128], strides = [1, 1]} : vector<4x128xf32> to vector<1x128xf32>
    %4 = vector.broadcast %2 : vector<8x1xf32> to vector<8x128xf32>
    %5 = vector.broadcast %3 : vector<1x128xf32> to vector<8x128xf32>
    %6 = arith.mulf %4, %5 : vector<8x128xf32>
    %7 = vector.extract_strided_slice %0 {offsets = [0, 1], sizes = [8, 1], strides = [1, 1]} : vector<8x4xf32> to vector<8x1xf32>
    %8 = vector.extract_strided_slice %1 {offsets = [1, 0], sizes = [1, 128], strides = [1, 1]} : vector<4x128xf32> to vector<1x128xf32>
    %9 = vector.broadcast %7 : vector<8x1xf32> to vector<8x128xf32>
    %10 = vector.broadcast %8 : vector<1x128xf32> to vector<8x128xf32>
    %11 = arith.mulf %9, %10 : vector<8x128xf32>
    %12 = arith.addf %6, %11 : vector<8x128xf32>
    %13 = vector.extract_strided_slice %0 {offsets = [0, 2], sizes = [8, 1], strides = [1, 1]} : vector<8x4xf32> to vector<8x1xf32>
    %14 = vector.extract_strided_slice %1 {offsets = [2, 0], sizes = [1, 128], strides = [1, 1]} : vector<4x128xf32> to vector<1x128xf32>
    %15 = vector.broadcast %13 : vector<8x1xf32> to vector<8x128xf32>
    %16 = vector.broadcast %14 : vector<1x128xf32> to vector<8x128xf32>
    %17 = arith.mulf %15, %16 : vector<8x128xf32>
    %18 = arith.addf %12, %17 : vector<8x128xf32>
    %19 = vector.extract_strided_slice %0 {offsets = [0, 3], sizes = [8, 1], strides = [1, 1]} : vector<8x4xf32> to vector<8x1xf32>
    %20 = vector.extract_strided_slice %1 {offsets = [3, 0], sizes = [1, 128], strides = [1, 1]} : vector<4x128xf32> to vector<1x128xf32>
    %21 = vector.broadcast %19 : vector<8x1xf32> to vector<8x128xf32>
    %22 = vector.broadcast %20 : vector<1x128xf32> to vector<8x128xf32>
    %23 = arith.mulf %21, %22 : vector<8x128xf32>
    %24 = arith.addf %18, %23 : vector<8x128xf32>
    %c0_3 = arith.constant 0 : index
    %c0_4 = arith.constant 0 : index
    %25 = vector.load %arg1[%c0_3, %c0_4] : memref<8x128xf32, #tpu.memory_space<vmem>>, vector<8x128xf32>
    %c0_5 = arith.constant 0 : index
    %c0_6 = arith.constant 0 : index
    %26 = vector.load %arg3[%c0_5, %c0_6] : memref<1x128xf32, #tpu.memory_space<vmem>>, vector<1x128xf32>
    %27 = vector.broadcast %26 : vector<1x128xf32> to vector<8x128xf32>
    %28 = arith.mulf %25, %27 : vector<8x128xf32>
    %29 = arith.addf %24, %28 : vector<8x128xf32>
    %c0_7 = arith.constant 0 : index
    %c0_8 = arith.constant 0 : index
    %30 = vector.load %arg4[%c0_7, %c0_8] : memref<1x128xf32, #tpu.memory_space<vmem>>, vector<1x128xf32>
    %31 = vector.broadcast %30 : vector<1x128xf32> to vector<8x128xf32>
    %32 = arith.addf %29, %31 : vector<8x128xf32>
    %c0_9 = arith.constant 0 : index
    %c0_10 = arith.constant 0 : index
    %33 = vector.load %arg5[%c0_9, %c0_10] : memref<8x128xf32, #tpu.memory_space<vmem>>, vector<8x128xf32>
    tpu.vector_store %arg5[%c0_9, %c0_10], %32 {strides = array<i32>} : memref<8x128xf32, #tpu.memory_space<vmem>>, vector<8x128xf32>,
    return
  }
}

</mosaic_0001>

<bundles_post_ra>
// kernel: indrnn_cell.1
= control target key start
LH: loop header
LB: loop body
LE: loop exit
PB: predicated region body
PF: predicated region fallthrough
CT: control target
= control target key end

     0   :  { %v96_v0 = vmov 0   ;;  %v97_v2 = vmov 2   ;;  %v98_v3 = vmov 1   ;;  %v99_v4 = vmov 3   ;;  %s148_s0 = inlined_call_operand.vmem [shape: f32[8,4], index: 0, kind: input, shape index: {}]   ;;  %s149_s2 = inlined_call_operand.vmem [shape: f32[4,128], index: 2, kind: input, shape index: {}]   ;;  %s150_s1 = inlined_call_operand.vmem [shape: f32[8,128], index: 1, kind: input, shape index: {}]   ;;  %s151_s3 = inlined_call_operand.vmem [shape: f32[1,128], index: 3, kind: input, shape index: {}]   ;;  %s152_s4 = inlined_call_operand.vmem [shape: f32[1,128], index: 4, kind: input, shape index: {}]   ;;  %s153_s5 = inlined_call_operand.vmem [shape: f32[8,128], index: 5, kind: output, shape index: {}]  }
   0x1   :  { %91 = vset.pattern.permute.xlu0 %v96_v0  ;;  %v20_v1 = vld [vmem:[%s148_s0] sm:$0xff]  ;;  %93 = vset.pattern.permute.xlu1 %v97_v2  ;;  %v27_v5 = vlaneseq }
   0x2   :  { %24 = vperm.xlu0 %91, %v20_v1   ;;  %43 = vperm.xlu1 %93, %v20_v1   ;;  %v21_v9 = vld [vmem:[%s149_s2] sm:$0xf] }
   0x3   :  { %v28_v6 = vshrl.u32 %v27_v5, 7  ;;  %v62_v22 = vld [vmem:[%s150_s1] sm:$0xff] }
   0x4   :  { %v85_v23 = vld [vmem:[%s151_s3] ss:$0 sm:$0xff] }
   0x5   :  { %v29_v7 = vsub.s32 0, %v28_v6  ;;  %v38_v8 = vsub.s32 1, %v28_v6  ;;  %v48_v11 = vsub.s32 2, %v28_v6  ;;  %v58_v13 = vsub.s32 3, %v28_v6  ;;  %v86_v30 = vld [vmem:[%s152_s4] ss:$0 sm:$0xff] }
   0x6   :  { %92 = vset.pattern.permute.xlu0 %v98_v3  ;;  %94 = vset.pattern.permute.xlu1 %v99_v4  ;;  %v70_v27 = vmul.f32 %v85_v23, %v62_v22 }
   0x7   :  { %33 = vperm.xlu0 %92, %v20_v1   ;;  %53 = vperm.xlu1 %94, %v20_v1   ;;  %v30_v14 = vrot.slane %v21_v9, %v29_v7  ;;  %v39_v15 = vrot.slane %v21_v9, %v38_v8  ;;  %v49_v16 = vrot.slane %v21_v9, %v48_v11 }
   0x8   :  { %v59_v17 = vrot.slane %v21_v9, %v58_v13 }
   0xb   :  { %95 = vset.pattern.permute.xlu0 %v99_v4 }
  0x81   :  { %v25_v10 = vpop.permute.xlu0 %24  ;;  %v44_v12 = vpop.permute.xlu1 %43 }
  0x82   :  { %v31_v20 = vmul.f32 %v30_v14, %v25_v10  ;;  %v50_v24 = vmul.f32 %v49_v16, %v44_v12 }
  0x86   :  { %v34_v18 = vpop.permute.xlu0 %33  ;;  %v54_v19 = vpop.permute.xlu1 %53 }
  0x87   :  { %v40_v21 = vmul.f32 %v39_v15, %v34_v18  ;;  %v60_v26 = vmul.f32 %v59_v17, %v54_v19 }
  0x89   :  { %v41_v25 = vadd.f32 %v40_v21, %v31_v20 }
  0x8b   :  { %v51_v28 = vadd.f32 %v50_v24, %v41_v25 }
  0x8d   :  { %v61_v29 = vadd.f32 %v60_v26, %v51_v28 }
  0x8f   :  { %v71_v31 = vadd.f32 %v70_v27, %v61_v29 }
  0x91   :  { %v79_v32 = vadd.f32 %v86_v30, %v71_v31 }
  0x93   :  { %80 = vst [vmem:[%s153_s5] sm:$0xff] %v79_v32 }

</bundles_post_ra>
